<compile_context>
chip_gen: v6e
topology: v6e:2x2x1
jax: 0.10.0
libtpu: 0.0.40
codegen_flags: <defaults>
</compile_context>

<pallas_src>
import math

import jax
import jax.numpy as jnp
from jax.experimental import pallas as pl
from jax.experimental.pallas import tpu as pltpu


def _round_up(v, m):
    return (v + m - 1) // m * m


def _pick_tile(dim_padded, preferred):
    """Largest multiple of 128 that is <= min(preferred, dim) and divides dim."""
    best = 128
    cap = min(preferred, dim_padded)
    t = 128
    while t <= cap:
        if dim_padded % t == 0:
            best = t
        t += 128
    return best


def _pad2d(x, rows, cols, dtype):
    """Cast + zero-pad a 2-D array to (rows, cols); no-ops when already padded."""
    x = x.astype(dtype)
    r, c = x.shape
    if r == rows and c == cols:
        return x
    return jnp.pad(x, ((0, rows - r), (0, cols - c)))


def _vmem_budget():
    """(vmem_limit_bytes, usable tile budget) sized per TPU generation."""
    cap = 64 * 1024 * 1024  # conservative default: v7x physical VMEM / TensorCore
    try:
        info = pltpu.get_tpu_info()
        cap = int(getattr(info, "vmem_capacity_bytes", cap)) or cap
    except Exception:
        pass
    # 48 MiB on v7x (64 MiB physical), 96 MiB on v5e/v6e (128 MiB physical).
    vmem_limit = min(cap * 3 // 4, 100 * 1024 * 1024)
    budget = max(vmem_limit - 6 * 1024 * 1024, vmem_limit // 2)  # compiler headroom
    return vmem_limit, budget


def _make_mm_kernel(has_bias, b_resident, tk):
    """out_tile = sum_k A[i,k] @ B[k] (+ bias), f32 accumulator over the K axis."""

    def kernel(*refs):
        if has_bias:
            a_ref, b_ref, bias_ref, o_ref, acc_ref = refs
        else:
            a_ref, b_ref, o_ref, acc_ref = refs
            bias_ref = None
        kk = pl.program_id(1)

        @pl.when(kk == 0)
        def _():
            acc_ref[...] = jnp.zeros_like(acc_ref)

        if b_resident:
            # B is held fully VMEM-resident (constant index_map); slice the
            # K-panel for this grid step.
            start = pl.multiple_of(kk * tk, tk)
            b_blk = b_ref[pl.ds(start, tk), :]
        else:
            b_blk = b_ref[...]

        acc_ref[...] += jnp.dot(a_ref[...], b_blk,
                                preferred_element_type=jnp.float32)

        @pl.when(kk == pl.num_programs(1) - 1)
        def _():
            acc = acc_ref[...]
            if has_bias:
                acc = acc + bias_ref[...]     # bias add once, in the epilogue
            o_ref[...] = acc.astype(o_ref.dtype)

    return kernel


def _tiled_matmul_padded(a, b, bias, out_dtype, compute_dtype,
                         tm_pref=1024, tk_pref=2048):
    """out = a @ b (+ bias) on pre-padded 128-aligned operands.

    a: (m_pad, k_pad), b: (k_pad, n_pad), bias: (1, n_pad) f32 or None.
    Returns the padded (m_pad, n_pad) product in out_dtype (no slicing here, so
    chained calls avoid slice + re-pad passes over HBM).
    """
    m_pad, k_pad = a.shape
    k_pad2, n_pad = b.shape
    assert k_pad == k_pad2, (a.shape, b.shape)
    assert m_pad % 128 == 0 and k_pad % 128 == 0 and n_pad % 128 == 0

    a = a.astype(compute_dtype)   # no-op if already compute_dtype
    b = b.astype(compute_dtype)
    in_item = jnp.dtype(compute_dtype).itemsize
    out_item = jnp.dtype(out_dtype).itemsize
    has_bias = bias is not None

    vmem_limit, budget = _vmem_budget()

    def footprint(tm, tk, resident):
        b_bytes = (k_pad if resident else tk) * n_pad * in_item * 2  # dbl buffer
        return (2 * tm * tk * in_item            # A double buffer
                + b_bytes                        # B
                + 2 * tm * n_pad * out_item      # out double buffer
                + tm * n_pad * 4                 # f32 accumulator
                + (2 * n_pad * 4 if has_bias else 0))

    # Very wide outputs (won't happen for typical GCN): split B's columns so
    # even minimal tiles fit the VMEM budget (v7x's 64 MiB hits this first).
    if footprint(128, 128, False) > budget and n_pad > 128:
        half = _round_up(n_pad // 2, 128)
        lhs = _tiled_matmul_padded(a, b[:, :half],
                                   None if bias is None else bias[:, :half],
                                   out_dtype, compute_dtype, tm_pref, tk_pref)
        rhs = _tiled_matmul_padded(a, b[:, half:],
                                   None if bias is None else bias[:, half:],
                                   out_dtype, compute_dtype, tm_pref, tk_pref)
        return jnp.concatenate([lhs, rhs], axis=1)

    tm = _pick_tile(m_pad, tm_pref)
    if m_pad >= 512 and m_pad // tm < 2:
        # Keep >= 2 row tiles so the "parallel" row axis can use both v7x TCs.
        tm = _pick_tile(m_pad, m_pad // 2)
    tk = _pick_tile(k_pad, tk_pref)

    # Hold B fully VMEM-resident (fetched once) when it fits comfortably.
    resident = 2 * k_pad * n_pad * in_item <= budget // 2

    def shrink_to_fit(tm, tk, resident):
        while footprint(tm, tk, resident) > budget and tk > 128:
            tk = _pick_tile(k_pad, tk // 2)
        while footprint(tm, tk, resident) > budget and tm > 128:
            tm = _pick_tile(m_pad, tm // 2)
        return tm, tk

    tm, tk = shrink_to_fit(tm, tk, resident)
    if footprint(tm, tk, resident) > budget:
        resident = False
        tm, tk = shrink_to_fit(tm, tk, resident)

    grid = (m_pad // tm, k_pad // tk)

    a_spec = pl.BlockSpec((tm, tk), lambda i, kk: (i, kk))
    if resident:
        b_spec = pl.BlockSpec((k_pad, n_pad), lambda i, kk: (0, 0))
    else:
        b_spec = pl.BlockSpec((tk, n_pad), lambda i, kk: (kk, 0))
    out_spec = pl.BlockSpec((tm, n_pad), lambda i, kk: (i, 0))

    in_specs = [a_spec, b_spec]
    operands = [a, b]
    if has_bias:
        in_specs.append(pl.BlockSpec((1, n_pad), lambda i, kk: (0, 0)))
        operands.append(bias)

    b_streams = 1 if resident else grid[0]
    cost = pl.CostEstimate(
        flops=2 * m_pad * k_pad * n_pad,
        transcendentals=0,
        bytes_accessed=(m_pad * k_pad * in_item
                        + b_streams * k_pad * n_pad * in_item
                        + m_pad * n_pad * out_item
                        + (n_pad * 4 if has_bias else 0)),
    )

    kernel = _make_mm_kernel(has_bias, resident, tk)

    return pl.pallas_call(
        kernel,
        out_shape=jax.ShapeDtypeStruct((m_pad, n_pad), out_dtype),
        grid_spec=pltpu.PrefetchScalarGridSpec(
            num_scalar_prefetch=0,
            grid=grid,
            in_specs=in_specs,
            out_specs=out_spec,
            scratch_shapes=[pltpu.VMEM((tm, n_pad), jnp.float32)],
        ),
        compiler_params=pltpu.CompilerParams(
            dimension_semantics=("parallel", "arbitrary"),
            vmem_limit_bytes=vmem_limit,
        ),
        cost_estimate=cost,
    )(*operands)


def graph_convolution(x, adj, weight, bias=None, compute_dtype=jnp.bfloat16):
    """GCN layer forward: adj @ x @ weight (+ bias), data_type=None path.

    x: [N, F_in], adj: [N, N] (dense stand-in for torch.spmm's sparse adj),
    weight: [F_in, F_out], bias: [F_out] or None.
    compute_dtype: MXU operand dtype (default bf16; accumulation is always f32.
    Note: the intermediate x@W / adj@x is also stored in compute_dtype).
    """
    # TODO(synk): the data_type == 'elliptic' path (concat([support, x]) before
    # the weight matmul) is not implemented; only the default path is covered.
    # TODO(synk): optional fp8 (e4m3) adj quantization for the v7x MXU is not
    # implemented (needs a per-dataset numerics check).
    out_dtype = x.dtype
    n = x.shape[0]
    f_in, f_out = weight.shape

    # Pad the node dim to a 512-granule when large (so the big MXU-friendly
    # tiles always divide it); feature dims to 128 (lane) granules.
    # Cast + pad each operand exactly once; intermediates stay padded.
    n_pad = _round_up(n, 128) if n <= 512 else _round_up(n, 512)
    f_in_pad = _round_up(f_in, 128)
    f_out_pad = _round_up(f_out, 128)

    adj_p = _pad2d(adj, n_pad, n_pad, compute_dtype)
    x_p = _pad2d(x, n_pad, f_in_pad, compute_dtype)
    w_p = _pad2d(weight, f_in_pad, f_out_pad, compute_dtype)
    bias_p = None
    if bias is not None:
        bias_p = _pad2d(bias.reshape(1, f_out), 1, f_out_pad, jnp.float32)

    if f_out <= f_in:
        # Reassociate: adj @ (x @ W) — the dominant N^2 matmul scales with F_out.
        xw_p = _tiled_matmul_padded(x_p, w_p, None, compute_dtype, compute_dtype)
        out_p = _tiled_matmul_padded(adj_p, xw_p, bias_p, out_dtype, compute_dtype)
    else:
        # F_out > F_in: original order is cheaper (intermediate stays [N, F_in]).
        sup_p = _tiled_matmul_padded(adj_p, x_p, None, compute_dtype, compute_dtype)
        out_p = _tiled_matmul_padded(sup_p, w_p, bias_p, out_dtype, compute_dtype)

    if n_pad == n and f_out_pad == f_out:
        return out_p
    return out_p[:n, :f_out]


if __name__ == "__main__":
    key = jax.random.PRNGKey(0)
    k_x, k_adj, k_w, k_b = jax.random.split(key, 4)

    # Small demo shapes consistent with the module (kernel pads to 128-granules;
    # at these sizes plain XLA would win — the kernel pays off at MXU scale).
    N, F_IN, F_OUT = 8, 16, 32

    x = jax.random.normal(k_x, (N, F_IN), dtype=jnp.float32)

    # Symmetric, row-normalized adjacency (dense stand-in for sparse adj).
    a = jax.random.uniform(k_adj, (N, N), dtype=jnp.float32)
    adj = (a + a.T) * 0.5 + jnp.eye(N, dtype=jnp.float32)
    adj = adj / jnp.sum(adj, axis=1, keepdims=True)

    # Parameter init matching reset_parameters(): uniform(-stdv, stdv).
    stdv = 1.0 / math.sqrt(F_OUT)
    weight = jax.random.uniform(k_w, (F_IN, F_OUT), dtype=jnp.float32,
                                minval=-stdv, maxval=stdv)
    bias = jax.random.uniform(k_b, (F_OUT,), dtype=jnp.float32,
                              minval=-stdv, maxval=stdv)

    ref = (adj @ x) @ weight + bias

    # f32 MXU path, with bias (tight tolerance).
    out_f32 = jax.block_until_ready(
        graph_convolution(x, adj, weight, bias, compute_dtype=jnp.float32))
    assert out_f32.shape == (N, F_OUT)
    assert out_f32.dtype == x.dtype
    assert jnp.allclose(out_f32, ref, atol=1e-5, rtol=1e-5)

    # Default path: bf16 MXU operands, f32 accumulation (looser tolerance).
    out_bf16 = jax.block_until_ready(graph_convolution(x, adj, weight, bias))
    assert out_bf16.dtype == x.dtype
    assert jnp.allclose(out_bf16, ref, atol=5e-2, rtol=5e-2)

    # bias=None path (static gate, no fake zero-bias add).
    out_nb = jax.block_until_ready(
        graph_convolution(x, adj, weight, None, compute_dtype=jnp.float32))
    assert jnp.allclose(out_nb, ref - bias, atol=1e-5, rtol=1e-5)

    # Reassociated path (F_out < F_in — the common GCN configuration).
    F_IN2, F_OUT2 = 64, 16
    x2 = jax.random.normal(k_x, (N, F_IN2), dtype=jnp.float32)
    stdv2 = 1.0 / math.sqrt(F_OUT2)
    w2 = jax.random.uniform(k_w, (F_IN2, F_OUT2), dtype=jnp.float32,
                            minval=-stdv2, maxval=stdv2)
    b2 = jax.random.uniform(k_b, (F_OUT2,), dtype=jnp.float32,
                            minval=-stdv2, maxval=stdv2)
    ref2 = (adj @ x2) @ w2 + b2
    out2 = jax.block_until_ready(
        graph_convolution(x2, adj, w2, b2, compute_dtype=jnp.float32))
    assert jnp.allclose(out2, ref2, atol=1e-4, rtol=1e-4)

    print("KERNEL_OK")
</pallas_src>

<mosaic_0001>
module attributes {stable_mosaic.version = 11 : i64} {
  func.func @kernel(%arg0: i32, %arg1: i32, %arg2: memref<128x128xf32, #tpu.memory_space<vmem>>, %arg3: memref<128x128xf32, #tpu.memory_space<vmem>>, %arg4: memref<128x128xf32, #tpu.memory_space<vmem>>, %arg5: memref<128x128xf32, #tpu.memory_space<vmem>>) attributes {dimension_semantics = [#tpu.dimension_semantics<parallel>, #tpu.dimension_semantics<arbitrary>], iteration_bounds = array<i64: 1, 1>, scalar_prefetch = 0 : i64, scratch_operands = 1 : i64, tpu.core_type = #tpu.core_type<tc>, window_params = [{transform_indices = @transform_0, window_bounds = array<i64: 128, 128>}, {pipeline_mode = #tpu.pipeline_mode<synchronous>, transform_indices = @transform_1, window_bounds = array<i64: 128, 128>}, {transform_indices = @transform_2, window_bounds = array<i64: 128, 128>}]} {
    %c0_i32 = arith.constant 0 : i32
    %0 = arith.cmpi eq, %arg1, %c0_i32 : i32
    %1 = arith.extui %0 : i1 to i32
    %c0_i32_0 = arith.constant 0 : i32
    %2 = arith.cmpi ne, %1, %c0_i32_0 : i32
    scf.if %2 {
      %cst_9 = arith.constant 0.000000e+00 : f32
      %15 = vector.broadcast %cst_9 : f32 to vector<128x128xf32>
      %c0_10 = arith.constant 0 : index
      %c0_11 = arith.constant 0 : index
      %16 = vector.load %arg5[%c0_10, %c0_11] : memref<128x128xf32, #tpu.memory_space<vmem>>, vector<128x128xf32>
      tpu.vector_store %arg5[%c0_10, %c0_11], %15 {strides = array<i32>} : memref<128x128xf32, #tpu.memory_space<vmem>>, vector<128x128xf32>,
    } else {
    }
    %c128_i32 = arith.constant 128 : i32
    %3 = arith.muli %arg1, %c128_i32 : i32
    %4 = tpu.assume_multiple %3, 128 : i32
    %5 = arith.index_cast %4 : i32 to index
    %c0 = arith.constant 0 : index
    %6 = vector.load %arg3[%5, %c0] : memref<128x128xf32, #tpu.memory_space<vmem>>, vector<128x128xf32>
    %c0_1 = arith.constant 0 : index
    %c0_2 = arith.constant 0 : index
    %7 = vector.load %arg5[%c0_1, %c0_2] : memref<128x128xf32, #tpu.memory_space<vmem>>, vector<128x128xf32>
    %c0_3 = arith.constant 0 : index
    %c0_4 = arith.constant 0 : index
    %8 = vector.load %arg2[%c0_3, %c0_4] : memref<128x128xf32, #tpu.memory_space<vmem>>, vector<128x128xf32>
    %cst = arith.constant dense<0.000000e+00> : vector<128x128xf32>
    %9 = tpu.matmul %8, %6, %cst {dimension_numbers = #tpu.dot_dimension_numbers<[1], [0], [0], [1], [0, 0, 1, 1], [], []>} : vector<128x128xf32>, vector<128x128xf32>, vector<128x128xf32> -> vector<128x128xf32>
    %10 = arith.addf %7, %9 : vector<128x128xf32>
    %c0_5 = arith.constant 0 : index
    %c0_6 = arith.constant 0 : index
    %11 = vector.load %arg5[%c0_5, %c0_6] : memref<128x128xf32, #tpu.memory_space<vmem>>, vector<128x128xf32>
    tpu.vector_store %arg5[%c0_5, %c0_6], %10 {strides = array<i32>} : memref<128x128xf32, #tpu.memory_space<vmem>>, vector<128x128xf32>,
    %c0_i32_7 = arith.constant 0 : i32
    %12 = arith.cmpi eq, %arg1, %c0_i32_7 : i32
    %13 = arith.extui %12 : i1 to i32
    %c0_i32_8 = arith.constant 0 : i32
    %14 = arith.cmpi ne, %13, %c0_i32_8 : i32
    scf.if %14 {
      %c0_9 = arith.constant 0 : index
      %c0_10 = arith.constant 0 : index
      %15 = vector.load %arg5[%c0_9, %c0_10] : memref<128x128xf32, #tpu.memory_space<vmem>>, vector<128x128xf32>
      %c0_11 = arith.constant 0 : index
      %c0_12 = arith.constant 0 : index
      %16 = vector.load %arg4[%c0_11, %c0_12] : memref<128x128xf32, #tpu.memory_space<vmem>>, vector<128x128xf32>
      tpu.vector_store %arg4[%c0_11, %c0_12], %15 {strides = array<i32>} : memref<128x128xf32, #tpu.memory_space<vmem>>, vector<128x128xf32>,
    } else {
    }
    return
  }
  func.func @transform_0(%arg0: i32, %arg1: i32) -> (i32, i32) {
    %c0_i32 = arith.constant 0 : i32
    return %arg0, %arg1 : i32, i32
  }
  func.func @transform_1(%arg0: i32, %arg1: i32) -> (i32, i32) {
    %c0_i32 = arith.constant 0 : i32
    %c0_i32_0 = arith.constant 0 : i32
    %c0_i32_1 = arith.constant 0 : i32
    return %c0_i32, %c0_i32_0 : i32, i32
  }
  func.func @transform_2(%arg0: i32, %arg1: i32) -> (i32, i32) {
    %c0_i32 = arith.constant 0 : i32
    %c0_i32_0 = arith.constant 0 : i32
    return %arg0, %c0_i32 : i32, i32
  }
}

</mosaic_0001>

<bundles_post_ra>
// kernel: tpu_custom_call.1
= control target key start
LH: loop header
LB: loop body
LE: loop exit
PB: predicated region body
PF: predicated region fallthrough
CT: control target
= control target key end

     0   :  { %7 = vsyncpa [#allocation4], 0  ;;  %s569_s0 = inlined_call_operand.hbm [shape: f32[128,128], index: 0, kind: input, shape index: {}]   ;;  %s570_s1 = inlined_call_operand.hbm [shape: f32[128,128], index: 1, kind: input, shape index: {}]   ;;  %s571_s2 = inlined_call_operand.hbm [shape: f32[128,128], index: 2, kind: output, shape index: {}]  }
   0x1   :  { %8 = vsyncpa [#allocation7], 0 }
   0x2   :  { %9 = vsyncpa [#allocation5], 0  ;;  %s531_s9 = smov [#allocation3]  }
   0x3   :  { %s15_s10 = sshll.u32 %s531_s9, 4  ;;  %s16_s10 = int_to_ptr.vmem [resolvable:$true] %s15_s10 }
   0x4   :  { %s473_s11 = scalar_lea.vmem %s16_s10, 2048  ;;  %p478_p1 = scmp.lt.s32.totalorder %s16_s10, %s16_s10 }
   0x5   :  { %p474_p0 = scmp.ne.s32.totalorder %s16_s10, %s473_s11  ;;  %p479_p2 = scmp.lt.s32.totalorder %s473_s11, %s473_s11 }
   0x7   :  { %p480_p3 = por %p479_p2, %p478_p1 }
   0x9   :  { %p481_p4 = pnand %p480_p3, %p474_p0 }
   0xb   :  { %484 = shalt.err (!%p481_p4)
}
   0xc   :  { %s532_s12 = smov 128   ;;  %s533_s13 = smov 8  }
   0xd   :  { %21 = dma.hbm_to_vmem [thread:$0]  %s569_s0, 2048, %s16_s10, [#allocation4], %s532_s12, %s532_s12, %s533_s13  }
   0xe   :  { %s534_s16 = smov [#allocation6]  }
   0xf   :  { %s27_s17 = sshll.u32 %s534_s16, 4  ;;  %s28_s17 = int_to_ptr.vmem [resolvable:$true] %s27_s17 }
  0x10   :  { %s493_s18 = scalar_lea.vmem %s28_s17, 2048  ;;  %p498_p6 = scmp.lt.s32.totalorder %s28_s17, %s28_s17 }
  0x11   :  { %p494_p5 = scmp.ne.s32.totalorder %s28_s17, %s493_s18  ;;  %p499_p7 = scmp.lt.s32.totalorder %s493_s18, %s493_s18 }
  0x13   :  { %p500_p8 = por %p499_p7, %p498_p6 }
  0x15   :  { %p501_p9 = pnand %p500_p8, %p494_p5 }
  0x17   :  { %504 = shalt.err (!%p501_p9)
}
  0x18   :  { %33 = dma.hbm_to_vmem [thread:$0]  %s570_s1, 2048, %s28_s17, [#allocation7], %s532_s12, %s532_s12, %s533_s13  }
  0x19   :  { %525 = dma.done.wait [#allocation4], 2048  }
  0x1a   :  { %526 = vsyncadd [#allocation4], 4294965248 }
  0x1b   :  { %527 = dma.done.wait [#allocation7], 2048  }
  0x1c   :  { %528 = vsyncadd [#allocation7], 4294965248  ;;  %v77_v0 = vld [vmem:[#allocation6 + $0x78] sm:$0xff]  ;;  %v76_v1 = vld [vmem:[#allocation6 + $0x70] sm:$0xff]  ;;  %s535_s0 = smov [#allocation8]  }
  0x1d   :  { %372 = vmatprep.subr.mxu0 %v77_v0  ;;  %428 = vmatprep.subr.mxu1 %v77_v0  ;;  %v75_v2 = vld [vmem:[#allocation6 + $0x68] sm:$0xff]  ;;  %v74_v3 = vld [vmem:[#allocation6 + $0x60] sm:$0xff]  ;;  %v73_v4 = vld [vmem:[#allocation6 + $0x58] sm:$0xff]  ;;  %s327_s1 = sshll.u32 %s535_s0, 4  ;;  %s328_s1 = int_to_ptr.vmem [resolvable:$true] %s327_s1 }
  0x1e   :  { %373 = vmatpush3.msra.mxu0 %v77_v0  ;;  %444 = vmatpush3.msra.mxu1 %v77_v0  ;;  %v72_v5 = vld [vmem:[#allocation6 + $0x50] sm:$0xff]  ;;  %v71_v6 = vld [vmem:[#allocation6 + $0x48] sm:$0xff]  ;;  %v70_v7 = vld [vmem:[#allocation6 + $0x40] sm:$0xff]  ;;  %s505_s21 = scalar_lea.vmem %s328_s1, 2048  ;;  %p510_p11 = scmp.lt.s32.totalorder %s328_s1, %s328_s1 }
  0x1f   :  { %374 = vmatprep.subr.mxu0 %v76_v1  ;;  %429 = vmatprep.subr.mxu1 %v76_v1  ;;  %v69_v8 = vld [vmem:[#allocation6 + $0x38] sm:$0xff]  ;;  %v68_v9 = vld [vmem:[#allocation6 + $0x30] sm:$0xff]  ;;  %v67_v10 = vld [vmem:[#allocation6 + $0x28] sm:$0xff]  ;;  %p506_p10 = scmp.ne.s32.totalorder %s328_s1, %s505_s21  ;;  %p511_p12 = scmp.lt.s32.totalorder %s505_s21, %s505_s21 }
  0x20   :  { %375 = vmatpush3.msra.mxu0 %v76_v1  ;;  %445 = vmatpush3.msra.mxu1 %v76_v1  ;;  %v66_v11 = vld [vmem:[#allocation6 + $0x20] sm:$0xff]  ;;  %v65_v12 = vld [vmem:[#allocation6 + $0x18] sm:$0xff]  ;;  %v64_v13 = vld [vmem:[#allocation6 + $0x10] sm:$0xff] }
  0x21   :  { %376 = vmatprep.subr.mxu0 %v75_v2  ;;  %430 = vmatprep.subr.mxu1 %v75_v2  ;;  %v63_v14 = vld [vmem:[#allocation6 + $0x8] sm:$0xff]  ;;  %v62_v15 = vld [vmem:[#allocation6] sm:$0xff]  ;;  %v96_v20 = vld [vmem:[#allocation3 + $0x10] sm:$0xff]  ;;  %p512_p13 = por %p511_p12, %p510_p11 }
  0x22   :  { %377 = vmatpush3.msra.mxu0 %v75_v2  ;;  %446 = vmatpush3.msra.mxu1 %v75_v2  ;;  %v94_v16 = vld [vmem:[#allocation3] sm:$0xff]  ;;  %v95_v18 = vld [vmem:[#allocation3 + $0x8] sm:$0xff]  ;;  %v104_v21 = vld [vmem:[#allocation3 + $0x50] sm:$0xff] }
  0x23   :  { %378 = vmatprep.subr.mxu0 %v74_v3  ;;  %431 = vmatprep.subr.mxu1 %v74_v3  ;;  %v102_v17 = vld [vmem:[#allocation3 + $0x40] sm:$0xff]  ;;  %v103_v19 = vld [vmem:[#allocation3 + $0x48] sm:$0xff]  ;;  %v97_v22 = vld [vmem:[#allocation3 + $0x18] sm:$0xff]  ;;  %p513_p0 = pnand %p512_p13, %p506_p10 }
  0x24   :  { %379 = vmatpush3.msra.mxu0 %v74_v3  ;;  %447 = vmatpush3.msra.mxu1 %v74_v3  ;;  %v105_v23 = vld [vmem:[#allocation3 + $0x58] sm:$0xff]  ;;  %v98_v24 = vld [vmem:[#allocation3 + $0x20] sm:$0xff]  ;;  %v99_v26 = vld [vmem:[#allocation3 + $0x28] sm:$0xff] }
  0x25   :  { %380 = vmatprep.subr.mxu0 %v73_v4  ;;  %432 = vmatprep.subr.mxu1 %v73_v4  ;;  %v106_v25 = vld [vmem:[#allocation3 + $0x60] sm:$0xff]  ;;  %v107_v27 = vld [vmem:[#allocation3 + $0x68] sm:$0xff]  ;;  %v100_v28 = vld [vmem:[#allocation3 + $0x30] sm:$0xff] }
  0x26   :  { %381 = vmatpush3.msra.mxu0 %v73_v4  ;;  %448 = vmatpush3.msra.mxu1 %v73_v4  ;;  %v108_v29 = vld [vmem:[#allocation3 + $0x70] sm:$0xff]  ;;  %v101_v30 = vld [vmem:[#allocation3 + $0x38] sm:$0xff] }
  0x27   :  { %382 = vmatprep.subr.mxu0 %v72_v5  ;;  %433 = vmatprep.subr.mxu1 %v72_v5  ;;  %v109_v31 = vld [vmem:[#allocation3 + $0x78] sm:$0xff] }
  0x28   :  { %383 = vmatpush3.msra.mxu0 %v72_v5  ;;  %449 = vmatpush3.msra.mxu1 %v72_v5 }
  0x29   :  { %384 = vmatprep.subr.mxu0 %v71_v6  ;;  %434 = vmatprep.subr.mxu1 %v71_v6 }
  0x2a   :  { %385 = vmatpush3.msra.mxu0 %v71_v6  ;;  %450 = vmatpush3.msra.mxu1 %v71_v6 }
  0x2b   :  { %386 = vmatprep.subr.mxu0 %v70_v7  ;;  %435 = vmatprep.subr.mxu1 %v70_v7 }
  0x2c   :  { %387 = vmatpush3.msra.mxu0 %v70_v7  ;;  %451 = vmatpush3.msra.mxu1 %v70_v7 }
  0x2d   :  { %388 = vmatprep.subr.mxu0 %v69_v8  ;;  %436 = vmatprep.subr.mxu1 %v69_v8 }
  0x2e   :  { %389 = vmatpush3.msra.mxu0 %v69_v8  ;;  %452 = vmatpush3.msra.mxu1 %v69_v8 }
  0x2f   :  { %390 = vmatprep.subr.mxu0 %v68_v9  ;;  %437 = vmatprep.subr.mxu1 %v68_v9 }
  0x30   :  { %391 = vmatpush3.msra.mxu0 %v68_v9  ;;  %453 = vmatpush3.msra.mxu1 %v68_v9 }
  0x31   :  { %392 = vmatprep.subr.mxu0 %v67_v10  ;;  %438 = vmatprep.subr.mxu1 %v67_v10 }
  0x32   :  { %393 = vmatpush3.msra.mxu0 %v67_v10  ;;  %454 = vmatpush3.msra.mxu1 %v67_v10 }
  0x33   :  { %394 = vmatprep.subr.mxu0 %v66_v11  ;;  %439 = vmatprep.subr.mxu1 %v66_v11 }
  0x34   :  { %395 = vmatpush3.msra.mxu0 %v66_v11  ;;  %455 = vmatpush3.msra.mxu1 %v66_v11 }
  0x35   :  { %396 = vmatprep.subr.mxu0 %v65_v12  ;;  %440 = vmatprep.subr.mxu1 %v65_v12 }
  0x36   :  { %397 = vmatpush3.msra.mxu0 %v65_v12  ;;  %456 = vmatpush3.msra.mxu1 %v65_v12 }
  0x37   :  { %398 = vmatprep.subr.mxu0 %v64_v13  ;;  %441 = vmatprep.subr.mxu1 %v64_v13 }
  0x38   :  { %399 = vmatpush3.msra.mxu0 %v64_v13  ;;  %457 = vmatpush3.msra.mxu1 %v64_v13 }
  0x39   :  { %400 = vmatprep.subr.mxu0 %v63_v14  ;;  %442 = vmatprep.subr.mxu1 %v63_v14 }
  0x3a   :  { %401 = vmatpush3.msra.mxu0 %v63_v14  ;;  %458 = vmatpush3.msra.mxu1 %v63_v14 }
  0x3b   :  { %402 = vmatprep.subr.mxu0 %v62_v15  ;;  %443 = vmatprep.subr.mxu1 %v62_v15 }
  0x3c   :  { %403 = vmatpush3.msra.mxu0 %v62_v15  ;;  %459 = vmatpush3.msra.mxu1 %v62_v15 }
  0x3d   :  { %404 = vmatprep.mubr.f32.mxu0 %v94_v16  ;;  %416 = vmatprep.mubr.f32.mxu1 %v102_v17 }
  0x3e   :  { %405 = vmatmul.mubr.f32.vlgmr.msra.gmra.mxu0 %v95_v18  ;;  %417 = vmatmul.mubr.f32.vlgmr.msra.gmra.mxu1 %v103_v19 }
  0x3f   :  { %407 = vmatprep.mubr.f32.mxu0 %v96_v20  ;;  %419 = vmatprep.mubr.f32.mxu1 %v104_v21 }
  0x42   :  { %408 = vmatmul.mubr.f32.gmra.mxu0 %v97_v22  ;;  %420 = vmatmul.mubr.f32.gmra.mxu1 %v105_v23 }
  0x43   :  { %410 = vmatprep.mubr.f32.mxu0 %v98_v24  ;;  %422 = vmatprep.mubr.f32.mxu1 %v106_v25 }
  0x46   :  { %411 = vmatmul.mubr.f32.gmra.mxu0 %v99_v26  ;;  %423 = vmatmul.mubr.f32.gmra.mxu1 %v107_v27 }
  0x47   :  { %413 = vmatprep.mubr.f32.mxu0 %v100_v28  ;;  %425 = vmatprep.mubr.f32.mxu1 %v108_v29 }
  0x4a   :  { %414 = vmatmul.mubr.f32.gmra.mxu0 %v101_v30  ;;  %426 = vmatmul.mubr.f32.gmra.mxu1 %v109_v31 }
  0xfe   :  { %v406_v32 = vpop.f32.mrf.mxu0  ;;  %v418_v33 = vpop.f32.mrf.mxu1 }
  0xff   :  { %307 = vst [vmem:[#allocation8 + $0x8] sm:$0xff] %v406_v32  ;;  %315 = vst [vmem:[#allocation8 + $0x48] sm:$0xff] %v418_v33 }
 0x100   :  { %v176_v34 = vpop.f32.mrf.mxu0  ;;  %v216_v35 = vpop.f32.mrf.mxu1 }
 0x101   :  { %306 = vst [vmem:[#allocation8] sm:$0xff] %v176_v34  ;;  %314 = vst [vmem:[#allocation8 + $0x40] sm:$0xff] %v216_v35 }
 0x102   :  { %v409_v36 = vpop.f32.mrf.mxu0  ;;  %v421_v37 = vpop.f32.mrf.mxu1 }
 0x103   :  { %309 = vst [vmem:[#allocation8 + $0x18] sm:$0xff] %v409_v36  ;;  %317 = vst [vmem:[#allocation8 + $0x58] sm:$0xff] %v421_v37 }
 0x104   :  { %v186_v38 = vpop.f32.mrf.mxu0  ;;  %v226_v39 = vpop.f32.mrf.mxu1 }
 0x105   :  { %308 = vst [vmem:[#allocation8 + $0x10] sm:$0xff] %v186_v38  ;;  %316 = vst [vmem:[#allocation8 + $0x50] sm:$0xff] %v226_v39 }
 0x106   :  { %v412_v40 = vpop.f32.mrf.mxu0  ;;  %v424_v41 = vpop.f32.mrf.mxu1 }
 0x107   :  { %311 = vst [vmem:[#allocation8 + $0x28] sm:$0xff] %v412_v40  ;;  %319 = vst [vmem:[#allocation8 + $0x68] sm:$0xff] %v424_v41 }
 0x108   :  { %v196_v42 = vpop.f32.mrf.mxu0  ;;  %v236_v43 = vpop.f32.mrf.mxu1 }
 0x109   :  { %310 = vst [vmem:[#allocation8 + $0x20] sm:$0xff] %v196_v42  ;;  %318 = vst [vmem:[#allocation8 + $0x60] sm:$0xff] %v236_v43 }
 0x10a   :  { %v415_v44 = vpop.f32.mrf.mxu0  ;;  %v427_v45 = vpop.f32.mrf.mxu1 }
 0x10b   :  { %313 = vst [vmem:[#allocation8 + $0x38] sm:$0xff] %v415_v44  ;;  %321 = vst [vmem:[#allocation8 + $0x78] sm:$0xff] %v427_v45 }
 0x10c   :  { %v206_v46 = vpop.f32.mrf.mxu0  ;;  %v246_v47 = vpop.f32.mrf.mxu1 }
 0x10d   :  { %312 = vst [vmem:[#allocation8 + $0x30] sm:$0xff] %v206_v46  ;;  %320 = vst [vmem:[#allocation8 + $0x70] sm:$0xff] %v246_v47 }
 0x10e   :  { %516 = shalt.err (!%p513_p0)
}
 0x10f   :  { %333 = dma.vmem_to_hbm [thread:$0]  %s328_s1, 2048, %s571_s2, [#allocation5], %s532_s12, %s532_s12, %s533_s13  }
 0x110   :  { %529 = dma.done.wait [#allocation5], 2048  }
 0x111   :  { %530 = vsyncadd [#allocation5], 4294965248 }
 0x112   :  { %337 = vsyncpa [#allocation4], 1 }
 0x113   :  { %338 = vsyncpa [#allocation7], 1 }
 0x114   :  { %339 = vsyncpa [#allocation5], 1 }

</bundles_post_ra>
